<compile_context>
chip_gen: v5e
topology: v5e:2x2
jax: 0.10.0
libtpu: 0.0.40
codegen_flags: <defaults>
</compile_context>

<pallas_src>
import functools

import jax
import jax.numpy as jnp
from jax import lax
from jax.experimental import pallas as pl
from jax.experimental.pallas import tpu as pltpu


def _wce_kernel(pred_ref, gold_ref, wrow_ref, num_ref, den_ref, *, n_valid, tile_n):
    # pred_ref: (tile_n, C) input dtype; gold_ref/wrow_ref: (tile_n, 1) i32/f32;
    # num_ref/den_ref: (1, 8, 128) f32 per-tile partials (scalar broadcast, lane-dense).
    i = pl.program_id(0)

    logits = pred_ref[...].astype(jnp.float32)            # (tile_n, C) f32 in-kernel
    gold = gold_ref[...]                                   # (tile_n, 1) i32
    w_i = wrow_ref[...]                                    # (tile_n, 1) f32 = w[gold_i]

    # Numerically-stable logsumexp per row.
    m = jnp.max(logits, axis=-1, keepdims=True)            # (tile_n, 1)
    # TODO(synk): optionally compute exp() in bf16 on v6e/v7x (native bf16 EUP, ~2x exp)
    # behind a flag if still EUP-bound after the 2-TC split; f32 kept for exactness.
    lse = jnp.log(jnp.sum(jnp.exp(logits - m), axis=-1, keepdims=True)) + m

    # Boolean-mask gather of the target logit (no f32 one-hot materialization).
    col = lax.broadcasted_iota(jnp.int32, logits.shape, 1)
    tgt = jnp.sum(jnp.where(col == gold, logits, 0.0), axis=-1, keepdims=True)

    nll = lse - tgt                                        # (tile_n, 1)

    # Mask rows beyond the true batch size (ragged last tile: OOB rows may hold garbage,
    # so guard the contributions with a select rather than a multiply).
    row = i * tile_n + lax.broadcasted_iota(jnp.int32, (tile_n, 1), 0)
    valid = row < n_valid
    num = jnp.sum(jnp.where(valid, w_i * nll, 0.0))        # scalar f32
    den = jnp.sum(jnp.where(valid, w_i, 0.0))              # scalar f32

    num_ref[...] = jnp.broadcast_to(num, num_ref.shape).astype(jnp.float32)
    den_ref[...] = jnp.broadcast_to(den, den_ref.shape).astype(jnp.float32)


def _vmem_budgets():
    """(per-tile working-set budget, vmem_limit_bytes cap) by TPU generation."""
    try:
        cap = int(pltpu.get_tpu_info().vmem_capacity_bytes)
    except Exception:
        cap = 64 * 1024 * 1024                 # conservative default (v7x per-TC VMEM)
    if cap >= 96 * 1024 * 1024:                # v5e / v6e: 128 MiB per core
        return 56 * 1024 * 1024, 96 * 1024 * 1024
    return 26 * 1024 * 1024, 44 * 1024 * 1024  # v7x: 64 MiB per core


def _pick_tile_n(n, c, itemsize, budget_bytes):
    """Rows per tile so (double-buffered raw input + ~5 f32 (rows,C) intermediates)
    fits the budget; multiple of 8 (or == n). Prefers an exact divisor of n."""
    if n <= 8:
        return n
    bytes_per_row = 2 * c * itemsize + 5 * c * 4
    t = max(8, (budget_bytes // bytes_per_row) // 8 * 8)
    if t >= n:
        return n            # one tile covers the whole batch (block dim == full dim)
    if n % 8 == 0:
        # Prefer an exact divisor of n (multiple of 8, >= t/2) to avoid a ragged tail.
        for cand in range(t, max(7, t // 2), -8):
            if n % cand == 0:
                return cand
    return t                 # ragged last tile handled by the in-kernel row mask


def weighted_cross_entropy(pred, gold, class_weights, *, tile_n=None):
    """pred: (N, C) float logits (f32 or bf16); gold: (N,) int labels; class_weights: (C,)."""
    N, C = pred.shape
    class_weights = class_weights.astype(jnp.float32)
    gold = gold.astype(jnp.int32)

    budget, limit_cap = _vmem_budgets()
    if tile_n is None:
        tile_n = _pick_tile_n(N, C, pred.dtype.itemsize, budget)
    num_tiles = pl.cdiv(N, tile_n)
    N_pad = num_tiles * tile_n

    # Wrapper-side gather of the per-row class weight (tiny), so the kernel never touches
    # the full (C,) weight vector.  Only the small (N,1) tensors get tile-aligned padding;
    # pred is streamed unpadded.
    gold2d = gold.reshape(N, 1)
    w_row = class_weights[gold].reshape(N, 1)
    if N_pad != N:
        gold2d = jnp.pad(gold2d, ((0, N_pad - N), (0, 0)))
        w_row = jnp.pad(w_row, ((0, N_pad - N), (0, 0)))

    kernel = functools.partial(_wce_kernel, n_valid=N, tile_n=tile_n)

    est = 2 * tile_n * C * pred.dtype.itemsize + 5 * tile_n * C * 4
    vmem_limit = int(min(limit_cap, max(32 * 1024 * 1024, est + (8 << 20))))

    num_out, den_out = pl.pallas_call(
        kernel,
        out_shape=(jax.ShapeDtypeStruct((num_tiles, 8, 128), jnp.float32),
                   jax.ShapeDtypeStruct((num_tiles, 8, 128), jnp.float32)),
        grid_spec=pltpu.PrefetchScalarGridSpec(
            num_scalar_prefetch=0,
            grid=(num_tiles,),
            in_specs=[
                # TODO(synk): add pipeline_mode=pl.Buffered(3) on this spec if bundle dumps
                # show exposed DMA for very large C (tile_n collapsing to 8-16 rows).
                pl.BlockSpec((tile_n, C), lambda i: (i, 0)),   # logits tile (input dtype)
                pl.BlockSpec((tile_n, 1), lambda i: (i, 0)),   # labels tile
                pl.BlockSpec((tile_n, 1), lambda i: (i, 0)),   # per-row class weight w[gold]
            ],
            out_specs=[
                pl.BlockSpec((1, 8, 128), lambda i: (i, 0, 0)),  # per-tile partial num
                pl.BlockSpec((1, 8, 128), lambda i: (i, 0, 0)),  # per-tile partial den
            ],
        ),
        compiler_params=pltpu.CompilerParams(
            # Batch tiles are fully independent (no cross-iteration scratch), so this axis
            # can shard across both TensorCores on v7x; neutral on v5e/v6e.
            dimension_semantics=("parallel",),
            vmem_limit_bytes=vmem_limit,
        ),
    )(pred, gold2d, w_row)

    # Tiny final reduction (num_tiles scalars each) done in the wrapper.
    return jnp.sum(num_out[:, 0, 0]) / jnp.sum(den_out[:, 0, 0])


if __name__ == "__main__":
    key = jax.random.PRNGKey(0)
    k_pred, k_gold, k_w = jax.random.split(key, 3)

    N, C = 8, 32  # small demo: 8 samples, 32 classes
    pred = jax.random.normal(k_pred, (N, C), dtype=jnp.float32)
    gold = jax.random.randint(k_gold, (N,), 0, C, dtype=jnp.int32)
    class_weights = jax.random.uniform(k_w, (C,), dtype=jnp.float32,
                                       minval=0.5, maxval=1.5)

    loss = weighted_cross_entropy(pred, gold, class_weights)
    loss = jax.block_until_ready(loss)

    # Pure-JAX reference (same math as torch.nn.CrossEntropyLoss(weight=w)).
    logp = jax.nn.log_softmax(pred, axis=-1)
    nll = -logp[jnp.arange(N), gold]
    w_i = class_weights[gold]
    ref = jnp.sum(w_i * nll) / jnp.sum(w_i)
    assert jnp.allclose(loss, ref, rtol=1e-5, atol=1e-5), (loss, ref)

    print("KERNEL_OK")
</pallas_src>

<mosaic_0001>
module attributes {stable_mosaic.version = 11 : i64} {
  func.func @_wce_kernel(%arg0: i32, %arg1: memref<8x32xf32, #tpu.memory_space<vmem>>, %arg2: memref<8x1xi32, #tpu.memory_space<vmem>>, %arg3: memref<8x1xf32, #tpu.memory_space<vmem>>, %arg4: memref<1x8x128xf32, #tpu.memory_space<vmem>>, %arg5: memref<1x8x128xf32, #tpu.memory_space<vmem>>) attributes {dimension_semantics = [#tpu.dimension_semantics<parallel>], iteration_bounds = array<i64: 1>, scalar_prefetch = 0 : i64, scratch_operands = 0 : i64, tpu.core_type = #tpu.core_type<tc>, window_params = [{transform_indices = @transform_0, window_bounds = array<i64: 8, 32>}, {transform_indices = @transform_1, window_bounds = array<i64: 8, 1>}, {transform_indices = @transform_2, window_bounds = array<i64: 8, 1>}, {transform_indices = @transform_3, window_bounds = array<i64: 1, 8, 128>}, {transform_indices = @transform_4, window_bounds = array<i64: 1, 8, 128>}]} {
    %c0 = arith.constant 0 : index
    %c0_0 = arith.constant 0 : index
    %0 = vector.load %arg1[%c0, %c0_0] : memref<8x32xf32, #tpu.memory_space<vmem>>, vector<8x32xf32>
    %c0_1 = arith.constant 0 : index
    %c0_2 = arith.constant 0 : index
    %1 = vector.load %arg2[%c0_1, %c0_2] : memref<8x1xi32, #tpu.memory_space<vmem>>, vector<8x1xi32>
    %c0_3 = arith.constant 0 : index
    %c0_4 = arith.constant 0 : index
    %2 = vector.load %arg3[%c0_3, %c0_4] : memref<8x1xf32, #tpu.memory_space<vmem>>, vector<8x1xf32>
    %cst = arith.constant dense<0xFF800000> : vector<8xf32>
    %3 = vector.multi_reduction <maximumf>, %0, %cst [1] : vector<8x32xf32> to vector<8xf32>
    %4 = vector.shape_cast %3 : vector<8xf32> to vector<8x1xf32>
    %5 = vector.broadcast %4 : vector<8x1xf32> to vector<8x32xf32>
    %6 = arith.subf %0, %5 : vector<8x32xf32>
    %7 = math.exp %6 : vector<8x32xf32>
    %cst_5 = arith.constant dense<0.000000e+00> : vector<8xf32>
    %8 = vector.multi_reduction <add>, %7, %cst_5 [1] : vector<8x32xf32> to vector<8xf32>
    %9 = vector.shape_cast %8 : vector<8xf32> to vector<8x1xf32>
    %10 = math.log %9 : vector<8x1xf32>
    %11 = arith.addf %10, %4 : vector<8x1xf32>
    %12 = tpu.iota {dimensions = array<i32: 1>} : vector<8x32xi32>
    %13 = vector.broadcast %1 : vector<8x1xi32> to vector<8x32xi32>
    %14 = arith.cmpi eq, %12, %13 : vector<8x32xi32>
    %cst_6 = arith.constant 0.000000e+00 : f32
    %15 = vector.broadcast %cst_6 : f32 to vector<8x32xf32>
    %16 = arith.select %14, %0, %15 : vector<8x32xi1>, vector<8x32xf32>
    %cst_7 = arith.constant dense<0.000000e+00> : vector<8xf32>
    %17 = vector.multi_reduction <add>, %16, %cst_7 [1] : vector<8x32xf32> to vector<8xf32>
    %18 = vector.shape_cast %17 : vector<8xf32> to vector<8x1xf32>
    %19 = arith.subf %11, %18 : vector<8x1xf32>
    %c8_i32 = arith.constant 8 : i32
    %20 = arith.muli %arg0, %c8_i32 : i32
    %21 = tpu.iota {dimensions = array<i32: 0>} : vector<8x1xi32>
    %22 = vector.broadcast %20 : i32 to vector<8x1xi32>
    %23 = arith.addi %22, %21 : vector<8x1xi32>
    %c8_i32_8 = arith.constant 8 : i32
    %24 = vector.broadcast %c8_i32_8 : i32 to vector<8x1xi32>
    %25 = arith.cmpi slt, %23, %24 : vector<8x1xi32>
    %26 = arith.mulf %2, %19 : vector<8x1xf32>
    %cst_9 = arith.constant 0.000000e+00 : f32
    %27 = vector.broadcast %cst_9 : f32 to vector<8x1xf32>
    %28 = arith.select %25, %26, %27 : vector<8x1xi1>, vector<8x1xf32>
    %29 = vector.shape_cast %28 : vector<8x1xf32> to vector<1x8x1xf32>
    %cst_10 = arith.constant dense<0.000000e+00> : vector<1xf32>
    %30 = vector.multi_reduction <add>, %29, %cst_10 [1, 2] : vector<1x8x1xf32> to vector<1xf32>
    %31 = vector.shape_cast %30 : vector<1xf32> to vector<1x1x1xf32>
    %32 = vector.extract %31[0, 0, 0] : f32 from vector<1x1x1xf32>
    %cst_11 = arith.constant 0.000000e+00 : f32
    %33 = vector.broadcast %cst_11 : f32 to vector<8x1xf32>
    %34 = arith.select %25, %2, %33 : vector<8x1xi1>, vector<8x1xf32>
    %35 = vector.shape_cast %34 : vector<8x1xf32> to vector<1x8x1xf32>
    %cst_12 = arith.constant dense<0.000000e+00> : vector<1xf32>
    %36 = vector.multi_reduction <add>, %35, %cst_12 [1, 2] : vector<1x8x1xf32> to vector<1xf32>
    %37 = vector.shape_cast %36 : vector<1xf32> to vector<1x1x1xf32>
    %38 = vector.extract %37[0, 0, 0] : f32 from vector<1x1x1xf32>
    %39 = vector.broadcast %32 : f32 to vector<1x8x128xf32>
    %c0_13 = arith.constant 0 : index
    %c0_14 = arith.constant 0 : index
    %c0_15 = arith.constant 0 : index
    %40 = vector.load %arg4[%c0_13, %c0_14, %c0_15] : memref<1x8x128xf32, #tpu.memory_space<vmem>>, vector<1x8x128xf32>
    tpu.vector_store %arg4[%c0_13, %c0_14, %c0_15], %39 {strides = array<i32>} : memref<1x8x128xf32, #tpu.memory_space<vmem>>, vector<1x8x128xf32>,
    %41 = vector.broadcast %38 : f32 to vector<1x8x128xf32>
    %c0_16 = arith.constant 0 : index
    %c0_17 = arith.constant 0 : index
    %c0_18 = arith.constant 0 : index
    %42 = vector.load %arg5[%c0_16, %c0_17, %c0_18] : memref<1x8x128xf32, #tpu.memory_space<vmem>>, vector<1x8x128xf32>
    tpu.vector_store %arg5[%c0_16, %c0_17, %c0_18], %41 {strides = array<i32>} : memref<1x8x128xf32, #tpu.memory_space<vmem>>, vector<1x8x128xf32>,
    return
  }
  func.func @transform_0(%arg0: i32) -> (i32, i32) {
    %c0_i32 = arith.constant 0 : i32
    %c0_i32_0 = arith.constant 0 : i32
    return %arg0, %c0_i32 : i32, i32
  }
  func.func @transform_1(%arg0: i32) -> (i32, i32) {
    %c0_i32 = arith.constant 0 : i32
    %c0_i32_0 = arith.constant 0 : i32
    return %arg0, %c0_i32 : i32, i32
  }
  func.func @transform_2(%arg0: i32) -> (i32, i32) {
    %c0_i32 = arith.constant 0 : i32
    %c0_i32_0 = arith.constant 0 : i32
    return %arg0, %c0_i32 : i32, i32
  }
  func.func @transform_3(%arg0: i32) -> (i32, i32, i32) {
    %c0_i32 = arith.constant 0 : i32
    %c0_i32_0 = arith.constant 0 : i32
    %c0_i32_1 = arith.constant 0 : i32
    return %arg0, %c0_i32, %c0_i32_0 : i32, i32, i32
  }
  func.func @transform_4(%arg0: i32) -> (i32, i32, i32) {
    %c0_i32 = arith.constant 0 : i32
    %c0_i32_0 = arith.constant 0 : i32
    %c0_i32_1 = arith.constant 0 : i32
    return %arg0, %c0_i32, %c0_i32_0 : i32, i32, i32
  }
}

</mosaic_0001>

<bundles_post_ra>
// kernel: tpu_custom_call.1
= control target key start
LH: loop header
LB: loop body
LE: loop exit
PB: predicated region body
PF: predicated region fallthrough
CT: control target
= control target key end

     0   :  { %10 = vsyncpa [#allocation3], 0  ;;  %vm21_vm0 = vcmask 261120   ;;  %s221_s0 = inlined_call_operand.vmem [shape: f32[8,32], index: 0, kind: input, shape index: {}]   ;;  %s222_s1 = inlined_call_operand.vmem [shape: s32[8,1], index: 1, kind: input, shape index: {}]   ;;  %s223_s2 = inlined_call_operand.vmem [shape: f32[8,1], index: 2, kind: input, shape index: {}]   ;;  %s224_s3 = inlined_call_operand.hbm [shape: f32[1,8,128], index: 3, kind: output, shape index: {0}]   ;;  %s225_s4 = inlined_call_operand.hbm [shape: f32[1,8,128], index: 4, kind: output, shape index: {1}]  }
   0x1   :  { %v18_v0 = vld [vmem:[%s221_s0] sm:$0xff] }
   0x2   :  { %11 = vsyncpa [#allocation5], 0  ;;  %v22_v1 = vsel %vm21_vm0, %v18_v0, -inf  ;;  %v175_v2 = vmov 0   ;;  %v19_v3 = vld [vmem:[%s222_s1] sm:$0xff]  ;;  %v34_v9 = vlaneseq  ;;  %vm53_vm2 = vcmask 7168  }
   0x3   :  { %118 = vset.pattern.permute.xlu0 %v175_v2  ;;  %v20_v19 = vld [vmem:[%s223_s2] sm:$0xff]  ;;  %s176_s2 = smov [#allocation2]   ;;  %s86_s22 = sshll.u32 %s224_s3, 4  ;;  %s87_s22 = int_to_ptr.hbm [resolvable:$true] %s86_s22 }
   0x4   :  { %23 = vmax.xlane.f32.xlu0 %v22_v1  ;;  %v35_v10 = vand.u32 127, %v34_v9  ;;  %v65_v23 = vsel %vm53_vm2, %v20_v19, 0.0  ;;  %s84_s19 = sshll.u32 %s176_s2, 4  ;;  %s177_s24 = smov [#allocation4]   ;;  %s85_s19 = int_to_ptr.vmem [resolvable:$true] %s84_s19 }
   0x5   :  { %s95_s25 = sshll.u32 %s177_s24, 4  ;;  %s97_s28 = sshll.u32 %s225_s4, 4  ;;  %s96_s25 = int_to_ptr.vmem [resolvable:$true] %s95_s25  ;;  %s98_s28 = int_to_ptr.hbm [resolvable:$true] %s97_s28 }
  0x18   :  { %37 = vperm.xlu0 %118, %v19_v3  }
  0x77   :  { %v24_v4 = vpop.xlane.xlu0 %23 }
  0x78   :  { %v25_v5 = vsub.f32 %v18_v0, %v24_v4 }
  0x7a   :  { %v26_v6 = vmul.f32 1.442695, %v25_v5 }
  0x7c   :  { %119 = vpow2.f32 %v26_v6 }
  0x82   :  { %v120_v7 = vpop.eup %119 }
  0x83   :  { %v28_v8 = vsel %vm21_vm0, %v120_v7, 0.0 }
  0x84   :  { %29 = vadd.xlane.f32.xlu1 %v28_v8 }
  0x8a   :  { %v38_v11 = vpop.permute.xlu0 %37 }
  0x8b   :  { %vm39_vm1 = vcmp.eq.s32.totalorder %v35_v10, %v38_v11 }
  0x8c   :  { %v40_v12 = vsel %vm39_vm1, %v18_v0, 0.0 }
  0x8d   :  { %v41_v13 = vsel %vm21_vm0, %v40_v12, 0.0 }
  0x8e   :  { %42 = vadd.xlane.f32.xlu1 %v41_v13 }
  0xf7   :  { %v30_v14 = vpop.xlane.xlu1 %29 }
  0xf8   :  { %121 = vlog2.f32 %v30_v14 }
  0xfe   :  { %v122_v15 = vpop.eup %121 }
  0xff   :  { %v32_v16 = vmul.f32 0.6931472, %v122_v15 }
 0x101   :  { %v33_v17 = vadd.f32 %v32_v16, %v24_v4  ;;  %v43_v18 = vpop.xlane.xlu1 %42 }
 0x103   :  { %v44_v20 = vsub.f32 %v33_v17, %v43_v18 }
 0x105   :  { %v51_v21 = vmul.f32 %v44_v20, %v20_v19 }
 0x107   :  { %v54_v22 = vsel %vm53_vm2, %v51_v21, 0.0 }
 0x108   :  { %55 = vadd.xlane.f32.xlu2 %v54_v22 }
 0x110   :  { %66 = vadd.xlane.f32.xlu2 %v65_v23 }
 0x17b   :  { %v56_v24 = vpop.xlane.xlu2 %55 }
 0x17c   :  { %v57_v25 = vrot.slane %v56_v24, 4 }
 0x17e   :  { %v58_v26 = vadd.f32 %v57_v25, %v56_v24 }
 0x180   :  { %v59_v27 = vrot.slane %v58_v26, 2 }
 0x182   :  { %v60_v28 = vadd.f32 %v59_v27, %v58_v26 }
 0x183   :  { %v67_v29 = vpop.xlane.xlu2 %66 }
 0x184   :  { %v68_v30 = vrot.slane %v67_v29, 4  ;;  %v61_v31 = vrot.slane %v60_v28, 1 }
 0x186   :  { %v69_v32 = vadd.f32 %v68_v30, %v67_v29  ;;  %v62_v33 = vadd.f32 %v61_v31, %v60_v28 }
 0x188   :  { %v70_v34 = vrot.slane %v69_v32, 2  ;;  %111 = vpush %v62_v33 }
 0x18a   :  { %v71_v35 = vadd.f32 %v70_v34, %v69_v32 }
 0x18c   :  { %v72_v36 = vrot.slane %v71_v35, 1 }
 0x18e   :  { %v73_v37 = vadd.f32 %v72_v36, %v71_v35 }
 0x190   :  { %113 = vpush %v73_v37 }
 0x1b9   :  { %s112_s23 = spop %111 }
 0x1ba   :  { %v75_v38 = vstv %s112_s23 }
 0x1bb   :  { %76 = vst [vmem:[#allocation2] sm:$0xff] %v75_v38 }
 0x1bc   :  { %89 = dma.vmem_to_hbm [thread:$0]  %s85_s19, 128, %s87_s22, [#allocation3]  }
 0x1c1   :  { %s114_s29 = spop %113 }
 0x1c2   :  { %v77_v39 = vstv %s114_s29 }
 0x1c3   :  { %78 = vst [vmem:[#allocation4] sm:$0xff] %v77_v39 }
 0x1c4   :  { %100 = dma.vmem_to_hbm [thread:$0]  %s96_s25, 128, %s98_s28, [#allocation5]  }
 0x1c5   :  { %171 = dma.done.wait [#allocation3], 128  }
 0x1c6   :  { %172 = vsyncadd [#allocation3], 4294967168 }
 0x1c7   :  { %173 = dma.done.wait [#allocation5], 128  }
 0x1c8   :  { %174 = vsyncadd [#allocation5], 4294967168 }
 0x1c9   :  { %109 = vsyncpa [#allocation3], 1 }
 0x1ca   :  { %110 = vsyncpa [#allocation5], 1 }

</bundles_post_ra>
